<compile_context>
chip_gen: v6e
topology: v6e:2x2x1
jax: 0.10.0
libtpu: 0.0.40
codegen_flags: <defaults>
</compile_context>

<pallas_src>
import functools

import jax
import jax.numpy as jnp
from jax.experimental import pallas as pl
from jax.experimental.pallas import tpu as pltpu

EPS = 1e-5


def _linear_bn_kernel(x_ref, w_ref, bn_ref, out_ref, *, relu):
    # x: (B, K) f32, resident across the N grid; w: (K, tn) bf16 column tile.
    x = x_ref[...].astype(jnp.bfloat16)
    h = jnp.dot(x, w_ref[...], preferred_element_type=jnp.float32)

    # BatchNorm1d (training mode) folded into one scale/shift. The Linear bias
    # is omitted: it is exactly cancelled by the mean subtraction and does not
    # affect the variance.
    mean = jnp.mean(h, axis=0, keepdims=True)
    var = jnp.maximum(jnp.mean(h * h, axis=0, keepdims=True) - mean * mean, 0.0)
    inv = jax.lax.rsqrt(var + EPS)

    bn = bn_ref[...]                      # (2, tn): row 0 = gamma, row 1 = beta
    scale = bn[0:1, :] * inv
    shift = bn[1:2, :] - mean * scale

    h = h * scale + shift
    if relu:
        h = jnp.maximum(h, 0.0)
    out_ref[...] = h.astype(out_ref.dtype)


def _pick_tile(n):
    # Largest lane-aligned column tile that still yields >=2 grid steps
    # (megacore sharding + DMA/compute overlap), capped at 512 to bound the
    # per-step weight residency in VMEM.
    for t in (512, 256, 128):
        if n % t == 0 and n // t >= 2:
            return t
    return n


def _linear_bn(x, w, bn, *, relu):
    B, K = x.shape
    Kw, N = w.shape
    assert Kw == K and bn.shape == (2, N)
    tn = _pick_tile(N)
    grid = (N // tn,)

    # x stays resident; weight / bn / out tiles are double-buffered.
    x_bytes = B * K * 4
    tile_bytes = K * tn * 2 + 2 * tn * 4 + B * tn * 4
    vmem_limit = int(min(max(2 * x_bytes + 2 * tile_bytes + (2 << 20), 8 << 20),
                         100 << 20))

    return pl.pallas_call(
        functools.partial(_linear_bn_kernel, relu=relu),
        out_shape=jax.ShapeDtypeStruct((B, N), jnp.float32),
        grid_spec=pltpu.PrefetchScalarGridSpec(
            num_scalar_prefetch=0,
            grid=grid,
            in_specs=[
                pl.BlockSpec((B, K), lambda j: (0, 0)),    # full batch, resident
                pl.BlockSpec((K, tn), lambda j: (0, j)),   # weight column tile
                pl.BlockSpec((2, tn), lambda j: (0, j)),   # packed gamma/beta
            ],
            out_specs=pl.BlockSpec((B, tn), lambda j: (0, j)),
        ),
        compiler_params=pltpu.CompilerParams(
            dimension_semantics=("parallel",),
            vmem_limit_bytes=vmem_limit,
        ),
    )(x, w, bn)


def projection_mlp(x, packed, num_layers=3):
    """SimSiam projection head forward (training-mode BN).

    packed: output of pack_params().  num_layers in {2, 3} mirrors set_layers().
    """
    if num_layers == 3:
        h = _linear_bn(x, packed["w1"], packed["bn1"], relu=True)
        h = _linear_bn(h, packed["w2"], packed["bn2"], relu=True)
        h = _linear_bn(h, packed["w3"], packed["bn3"], relu=False)
    elif num_layers == 2:
        h = _linear_bn(x, packed["w1"], packed["bn1"], relu=True)
        h = _linear_bn(h, packed["w3"], packed["bn3"], relu=False)
    else:
        raise ValueError("num_layers must be 2 or 3")
    return h


def init_params(key, in_dim, hidden_dim, out_dim):
    """PyTorch-style f32 master parameters (module shapes from __init__).

    NOTE: layer3's BN is BatchNorm1d(hidden_dim) in the original code, which is
    only valid when out_dim == hidden_dim; we follow that.
    """
    assert out_dim == hidden_dim, "original module requires out_dim == hidden_dim"
    ks = jax.random.split(key, 12)

    def lin(kw, kb, fan_in, fan_out):
        bound = 1.0 / jnp.sqrt(fan_in)
        w = jax.random.uniform(kw, (fan_in, fan_out), jnp.float32, -bound, bound)
        b = jax.random.uniform(kb, (1, fan_out), jnp.float32, -bound, bound)
        return w, b

    w1, b1 = lin(ks[0], ks[1], in_dim, hidden_dim)
    w2, b2 = lin(ks[2], ks[3], hidden_dim, hidden_dim)
    w3, b3 = lin(ks[4], ks[5], hidden_dim, out_dim)

    # PyTorch initializes gamma=1, beta=0; randomize here so the affine path of
    # the kernel is exercised numerically.
    def bn(kg, kb, d):
        g = jax.random.uniform(kg, (1, d), jnp.float32, 0.5, 1.5)
        be = jax.random.uniform(kb, (1, d), jnp.float32, -0.5, 0.5)
        return g, be

    g1, be1 = bn(ks[6], ks[7], hidden_dim)
    g2, be2 = bn(ks[8], ks[9], hidden_dim)
    g3, be3 = bn(ks[10], ks[11], hidden_dim)

    return dict(w1=w1, b1=b1, g1=g1, be1=be1,
                w2=w2, b2=b2, g2=g2, be2=be2,
                w3=w3, b3=b3, g3=g3, be3=be3)


def pack_params(p):
    """Kernel-format params: bf16 weights in HBM, (2, N) packed gamma/beta.
    Linear biases are dropped — BN's mean subtraction cancels them exactly."""
    def pk(w, g, be):
        return w.astype(jnp.bfloat16), jnp.concatenate([g, be], axis=0)

    w1, bn1 = pk(p["w1"], p["g1"], p["be1"])
    w2, bn2 = pk(p["w2"], p["g2"], p["be2"])
    w3, bn3 = pk(p["w3"], p["g3"], p["be3"])
    return dict(w1=w1, bn1=bn1, w2=w2, bn2=bn2, w3=w3, bn3=bn3)


def reference_pytorch(x, p):
    """Faithful f32 PyTorch training-mode forward (includes Linear biases)."""
    def bn(h, g, be):
        m = jnp.mean(h, axis=0, keepdims=True)
        v = jnp.mean((h - m) ** 2, axis=0, keepdims=True)
        return (h - m) * jax.lax.rsqrt(v + EPS) * g + be

    h = jnp.maximum(bn(x @ p["w1"] + p["b1"], p["g1"], p["be1"]), 0.0)
    h = jnp.maximum(bn(h @ p["w2"] + p["b2"], p["g2"], p["be2"]), 0.0)
    return bn(h @ p["w3"] + p["b3"], p["g3"], p["be3"])


def reference_matched(x, packed):
    """Pure-JAX model of the exact kernel math (bf16 dot operands, folded BN,
    E[h^2]-mean^2 variance, no bias) — used for a tight numerical check."""
    def layer(h, w, bnp, relu):
        y = jnp.dot(h.astype(jnp.bfloat16), w, preferred_element_type=jnp.float32)
        m = jnp.mean(y, axis=0, keepdims=True)
        v = jnp.maximum(jnp.mean(y * y, axis=0, keepdims=True) - m * m, 0.0)
        scale = bnp[0:1] * jax.lax.rsqrt(v + EPS)
        y = y * scale + (bnp[1:2] - m * scale)
        return jnp.maximum(y, 0.0) if relu else y

    h = layer(x, packed["w1"], packed["bn1"], True)
    h = layer(h, packed["w2"], packed["bn2"], True)
    return layer(h, packed["w3"], packed["bn3"], False)


if __name__ == "__main__":
    # Small but TPU-friendly shapes: lane-aligned feature dims, sublane-aligned
    # batch.  Real SimSiam sizes (B>=256, 2048-wide layers) use the same code
    # path; the N grid then has 4+ steps so weight tiles pipeline and both v7x
    # TensorCores are engaged.
    B, IN_DIM, HIDDEN, OUT = 32, 128, 256, 256

    key = jax.random.PRNGKey(0)
    kx, kp = jax.random.split(key)
    x = jax.random.normal(kx, (B, IN_DIM), jnp.float32)

    raw = init_params(kp, IN_DIM, HIDDEN, OUT)
    packed = pack_params(raw)

    out = jax.block_until_ready(projection_mlp(x, packed))
    assert out.shape == (B, OUT), out.shape

    # Tight check: kernel vs. pure-JAX model of the identical math.
    ref_m = reference_matched(x, packed)
    assert jnp.allclose(out, ref_m, atol=1e-3, rtol=1e-3), "mismatch vs matched ref"

    # Loose check: faithful f32 PyTorch-semantics forward. Differences come
    # only from bf16 matmul operands (and the exactly-cancelled biases).
    ref_f32 = reference_pytorch(x, raw)
    assert jnp.allclose(out, ref_f32, atol=7e-2, rtol=7e-2), "mismatch vs f32 ref"

    print("KERNEL_OK")
</pallas_src>

<mosaic_0001>
module attributes {stable_mosaic.version = 11 : i64} {
  func.func @_linear_bn_kernel(%arg0: i32, %arg1: memref<32x128xf32, #tpu.memory_space<vmem>>, %arg2: memref<128x128xbf16, #tpu.memory_space<vmem>>, %arg3: memref<2x128xf32, #tpu.memory_space<vmem>>, %arg4: memref<32x128xf32, #tpu.memory_space<vmem>>) attributes {dimension_semantics = [#tpu.dimension_semantics<parallel>], iteration_bounds = array<i64: 2>, scalar_prefetch = 0 : i64, scratch_operands = 0 : i64, tpu.core_type = #tpu.core_type<tc>, window_params = [{pipeline_mode = #tpu.pipeline_mode<synchronous>, transform_indices = @transform_0, window_bounds = array<i64: 32, 128>}, {transform_indices = @transform_1, window_bounds = array<i64: 128, 128>}, {transform_indices = @transform_2, window_bounds = array<i64: 2, 128>}, {transform_indices = @transform_3, window_bounds = array<i64: 32, 128>}]} {
    %c0 = arith.constant 0 : index
    %c0_0 = arith.constant 0 : index
    %0 = vector.load %arg1[%c0, %c0_0] : memref<32x128xf32, #tpu.memory_space<vmem>>, vector<32x128xf32>
    %1 = arith.truncf %0 : vector<32x128xf32> to vector<32x128xbf16>
    %c0_1 = arith.constant 0 : index
    %c0_2 = arith.constant 0 : index
    %2 = vector.load %arg2[%c0_1, %c0_2] : memref<128x128xbf16, #tpu.memory_space<vmem>>, vector<128x128xbf16>
    %cst = arith.constant dense<0.000000e+00> : vector<32x128xf32>
    %3 = tpu.matmul %1, %2, %cst {dimension_numbers = #tpu.dot_dimension_numbers<[1], [0], [0], [1], [0, 0, 1, 1], [], []>} : vector<32x128xbf16>, vector<128x128xbf16>, vector<32x128xf32> -> vector<32x128xf32>
    %cst_3 = arith.constant dense<0.000000e+00> : vector<128xf32>
    %4 = vector.multi_reduction <add>, %3, %cst_3 [0] : vector<32x128xf32> to vector<128xf32>
    %5 = vector.shape_cast %4 : vector<128xf32> to vector<1x128xf32>
    %cst_4 = arith.constant 3.200000e+01 : f32
    %6 = vector.broadcast %cst_4 : f32 to vector<1x128xf32>
    %7 = arith.divf %5, %6 : vector<1x128xf32>
    %8 = arith.mulf %3, %3 : vector<32x128xf32>
    %cst_5 = arith.constant dense<0.000000e+00> : vector<128xf32>
    %9 = vector.multi_reduction <add>, %8, %cst_5 [0] : vector<32x128xf32> to vector<128xf32>
    %10 = vector.shape_cast %9 : vector<128xf32> to vector<1x128xf32>
    %cst_6 = arith.constant 3.200000e+01 : f32
    %11 = vector.broadcast %cst_6 : f32 to vector<1x128xf32>
    %12 = arith.divf %10, %11 : vector<1x128xf32>
    %13 = arith.mulf %7, %7 : vector<1x128xf32>
    %14 = arith.subf %12, %13 : vector<1x128xf32>
    %cst_7 = arith.constant 0.000000e+00 : f32
    %15 = vector.broadcast %cst_7 : f32 to vector<1x128xf32>
    %16 = arith.maximumf %14, %15 : vector<1x128xf32>
    %cst_8 = arith.constant 9.99999974E-6 : f32
    %17 = vector.broadcast %cst_8 : f32 to vector<1x128xf32>
    %18 = arith.addf %16, %17 : vector<1x128xf32>
    %19 = math.rsqrt %18 : vector<1x128xf32>
    %c0_9 = arith.constant 0 : index
    %c0_10 = arith.constant 0 : index
    %20 = vector.load %arg3[%c0_9, %c0_10] : memref<2x128xf32, #tpu.memory_space<vmem>>, vector<2x128xf32>
    %21 = vector.extract_strided_slice %20 {offsets = [0, 0], sizes = [1, 128], strides = [1, 1]} : vector<2x128xf32> to vector<1x128xf32>
    %22 = arith.mulf %21, %19 : vector<1x128xf32>
    %23 = vector.extract_strided_slice %20 {offsets = [1, 0], sizes = [1, 128], strides = [1, 1]} : vector<2x128xf32> to vector<1x128xf32>
    %24 = arith.mulf %7, %22 : vector<1x128xf32>
    %25 = arith.subf %23, %24 : vector<1x128xf32>
    %26 = vector.broadcast %22 : vector<1x128xf32> to vector<32x128xf32>
    %27 = arith.mulf %3, %26 : vector<32x128xf32>
    %28 = vector.broadcast %25 : vector<1x128xf32> to vector<32x128xf32>
    %29 = arith.addf %27, %28 : vector<32x128xf32>
    %cst_11 = arith.constant 0.000000e+00 : f32
    %30 = vector.broadcast %cst_11 : f32 to vector<32x128xf32>
    %31 = arith.maximumf %29, %30 : vector<32x128xf32>
    %c0_12 = arith.constant 0 : index
    %c0_13 = arith.constant 0 : index
    %32 = vector.load %arg4[%c0_12, %c0_13] : memref<32x128xf32, #tpu.memory_space<vmem>>, vector<32x128xf32>
    tpu.vector_store %arg4[%c0_12, %c0_13], %31 {strides = array<i32>} : memref<32x128xf32, #tpu.memory_space<vmem>>, vector<32x128xf32>,
    return
  }
  func.func @transform_0(%arg0: i32) -> (i32, i32) {
    %c0_i32 = arith.constant 0 : i32
    %c0_i32_0 = arith.constant 0 : i32
    %c0_i32_1 = arith.constant 0 : i32
    return %c0_i32, %c0_i32_0 : i32, i32
  }
  func.func @transform_1(%arg0: i32) -> (i32, i32) {
    %c0_i32 = arith.constant 0 : i32
    %c0_i32_0 = arith.constant 0 : i32
    return %c0_i32, %arg0 : i32, i32
  }
  func.func @transform_2(%arg0: i32) -> (i32, i32) {
    %c0_i32 = arith.constant 0 : i32
    %c0_i32_0 = arith.constant 0 : i32
    return %c0_i32, %arg0 : i32, i32
  }
  func.func @transform_3(%arg0: i32) -> (i32, i32) {
    %c0_i32 = arith.constant 0 : i32
    %c0_i32_0 = arith.constant 0 : i32
    return %c0_i32, %arg0 : i32, i32
  }
}

</mosaic_0001>

<bundles_post_ra>
// kernel: tpu_custom_call.1
= control target key start
LH: loop header
LB: loop body
LE: loop exit
PB: predicated region body
PF: predicated region fallthrough
CT: control target
= control target key end

     0   :  { %8 = vsyncpa [#allocation3], 0  ;;  %s1081_s0 = inlined_call_operand.hbm [shape: f32[32,128], index: 0, kind: input, shape index: {}]   ;;  %s1082_s1 = inlined_call_operand.hbm [shape: bf16[128,256], index: 1, kind: input, shape index: {}]   ;;  %s1083_s2 = inlined_call_operand.hbm [shape: f32[2,256], index: 2, kind: input, shape index: {}]   ;;  %s1084_s3 = inlined_call_operand.hbm [shape: f32[32,256], index: 3, kind: output, shape index: {}]  }
   0x1   :  { %9 = vsyncpa [#allocation6], 0 }
   0x2   :  { %11 = vsyncpa [#allocation6 + $0x1], 0 }
   0x3   :  { %12 = vsyncpa [#allocation4], 0 }
   0x4   :  { %14 = vsyncpa [#allocation4 + $0x1], 0  ;;  %s853_s12 = smov 0   ;;  %s855_s13 = smov 0  }
   0x5   :  { %s857_s14 = smov 0   ;;  %s859_s15 = smov 0  }
   0x6 LB: > { %s874_s16 = sadd.s32 1, %s820_s15   ;;  %s48_s17 = sadd.s32 1, %s816_s14  ;;  %s820_s15 = sphi %s859_s15, %s1106_s15   ;;  %s816_s14 = sphi %s857_s14, %s1105_s14   ;;  %s812_s13 = sphi %s855_s13, %s1104_s13   ;;  %s808_s12 = sphi %s853_s12, %s1103_s12  }
   0x7   : > { %s45_s18 = ssub.s32 %s820_s15, %s874_s16  ;;  %p55_p0 = scmp.ne.s32.totalorder %s816_s14, %s812_s13 }
   0x8   : > { %p46_p1 = scmp.eq.s32.totalorder %s45_s18, 0  ;;  %p56_p2 = scmp.eq.s32.totalorder %s820_s15, 0 }
   0x9   : > { %p617_p5 = scmp.lt.s32.totalorder %s820_s15, 2  ;;  %s150_s20 = sand.u32 1, %s820_s15  }
   0xa   : > { %s884_s19 = scalar_select %p46_p1, %s816_s14, %s48_s17  }
   0xb   : > { %p57_p4 = por %p56_p2, %p55_p0  ;;  %s152_s21 = sand.u32 1, %s816_s14  }
   0xc   : > { %s540_s22 = sshll.u32 %s152_s21, 6  ;;  %s541_s23 = sshll.u32 %s820_s15, 6 }
   0xd   : > { %s898_s26 = scalar_lea.hbm %s1082_s1, %s541_s23  ;;  %s154_s27 = scalar_lea.vmem [#allocation5], %s540_s22 }
   0xe   : > { %s160_s28 = sshll.u32 %s154_s27, 4  ;;  %p902_p6 = pnand %p617_p5, %p57_p4  ;;  %s900_s28 = int_to_ptr.vmem [resolvable:$true] %s160_s28 }
   0xf   : > { %s906_s30 = scalar_lea.sflag [#allocation6], %s150_s20  ;;  %s670_s4 = scalar_lea.hbm %s898_s26, 1024 }
  0x10   : > { %p671_p7 = scmp.ne.s32.totalorder %s898_s26, %s670_s4  ;;  %p1086_p8 = pneg %p902_p6 }
  0x11   : > { %s675_s7 = scalar_lea.hbm %s1082_s1, 2048  ;;  %p676_p11 = scmp.lt.s32.totalorder %s898_s26, %s1082_s1 }
  0x12   : > { %p673_p9 = pnand %p1086_p8, %p671_p7  ;;  %p677_p12 = scmp.lt.s32.totalorder %s675_s7, %s670_s4 }
  0x14   : > { %p674_p10 = pneg %p673_p9  ;;  %p678_p13 = por %p677_p12, %p676_p11 }
  0x16   : > { %p679_p1 = pnand %p678_p13, %p674_p10 }
  0x18   : > { %682 = shalt.err (!%p679_p1)
}
  0x19   : > { %s683_s10 = scalar_lea.vmem %s900_s28, 1024  ;;  %s822_s11 = smov [#allocation5]  }
  0x1a   : > { %p684_p2 = scmp.ne.s32.totalorder %s900_s28, %s683_s10  ;;  %s688_s17 = sshll.u32 %s822_s11, 4  ;;  %s689_s17 = int_to_ptr.vmem [resolvable:$false] %s688_s17 }
  0x1b   : > { %s690_s18 = scalar_lea.vmem %s689_s17, 2048  ;;  %p691_p7 = scmp.lt.s32.totalorder %s900_s28, %s689_s17 }
  0x1c   : > { %p686_p4 = pnand %p684_p2, %p1086_p8  ;;  %p692_p9 = scmp.lt.s32.totalorder %s690_s18, %s683_s10 }
  0x1e   : > { %p687_p5 = pneg %p686_p4  ;;  %p693_p3 = por %p692_p9, %p691_p7 }
  0x20   : > { %p694_p11 = pnand %p693_p3, %p687_p5 }
  0x22   : > { %697 = shalt.err (!%p694_p11)
}
  0x23   : > { %s823_s20 = smov 128   ;;  %s824_s22 = smov 64  }
  0x24   : > { %s825_s23 = smov 4   ;;  %s935_s24 = sadd.s32 4294967295, %s820_s15  }
  0x25   : > { %608 = dma.hbm_to_vmem [thread:$0]  (!%p902_p6), %s898_s26, 1024, %s900_s28, %s906_s30, %s823_s20, %s824_s22, %s825_s23  }
  0x26   : > { %s536_s25 = sadd.s32 4294967294, %s820_s15   ;;  %p61_p3 = scmp.ne.s32.totalorder %s812_s13, %s808_s12 }
  0x27   : > { %p1085_p10 = scmp.eq.s32.totalorder %s935_s24, 0  ;;  %p111_p12 = scmp.eq.s32.totalorder %s935_s24, 1 }
  0x28   : > { %p117_p13 = scmp.eq.s32.totalorder %s536_s25, 1  ;;  %p537_p1 = scmp.ge.s32.totalorder %s820_s15, 1 }
  0x29   : > { %p945_p2 = por %p1085_p10, %p61_p3  ;;  %p952_p4 = por %p111_p12, %p55_p0 }
  0x2a   : > { %p956_p5 = por %p117_p13, %p61_p3  ;;  %p124_p7 = scmp.lt.s32.totalorder %s820_s15, 3 }
  0x2b   : > { %s1090_s27 = scalar_select %p945_p2, 1, 0 }
  0x2c   : > { %s1091_s26 = scalar_select %p952_p4, 1, 0 }
  0x2d   : > { %s1092_s28 = scalar_select %p956_p5, 1, 0 }
  0x2e   : > { %p961_p9 = pnand %p537_p1, %p124_p7  ;;  %s826_s5 = smov [#allocation2]  }
  0x2f   : > { %s136_s6 = sshll.u32 %s826_s5, 4  ;;  %s542_s7 = sshll.u32 %s152_s21, 1  ;;  %s137_s6 = int_to_ptr.vmem [resolvable:$true] %s136_s6 }
  0x30   : > { %p601_p11 = pneg %p961_p9  ;;  %s543_s8 = sshll.u32 %s820_s15, 5 }
  0x31   : > { %s979_s17 = scalar_lea.hbm %s1083_s2, %s543_s8  ;;  %s174_s18 = scalar_lea.vmem [#allocation7], %s542_s7 }
  0x32   : > { %p972_p0 = pnand %p601_p11, %p1085_p10  ;;  %s181_s22 = sshll.u32 %s174_s18, 4  ;;  %s981_s22 = int_to_ptr.vmem [resolvable:$true] %s181_s22 }
  0x33   : > { %s709_s23 = scalar_lea.vmem %s137_s6, 512  ;;  %p717_p7 = scmp.lt.s32.totalorder %s137_s6, %s137_s6 }
  0x34   : > { %p700_p3 = pneg %p972_p0  ;;  %p710_p12 = scmp.ne.s32.totalorder %s137_s6, %s709_s23 }
  0x35   : > { %p718_p11 = scmp.lt.s32.totalorder %s709_s23, %s709_s23 }
  0x36   : > { %p712_p13 = pnand %p710_p12, %p700_p3 }
  0x37   : > { %p719_p10 = por %p718_p11, %p717_p7 }
  0x38   : > { %p713_p1 = pneg %p712_p13 }
  0x3a   : > { %p720_p8 = pnand %p719_p10, %p713_p1 }
  0x3c   : > { %723 = shalt.err (!%p720_p8)
}
  0x3d   : > { %s827_s21 = smov 8   ;;  %s724_s7 = scalar_lea.hbm %s979_s17, 32 }
  0x3e   : > { %604 = dma.hbm_to_vmem [thread:$0]  (!%p972_p0), %s1081_s0, 512, %s137_s6, [#allocation3], %s823_s20, %s823_s20, %s827_s21  }
  0x3f   : > { %p725_p3 = scmp.ne.s32.totalorder %s979_s17, %s724_s7  ;;  %p1095_p12 = pneg %p902_p6 }
  0x40   : > { %s729_s9 = scalar_lea.hbm %s1083_s2, 64  ;;  %p730_p8 = scmp.lt.s32.totalorder %s979_s17, %s1083_s2 }
  0x41   : > { %p727_p13 = pnand %p725_p3, %p1095_p12  ;;  %p731_p1 = scmp.lt.s32.totalorder %s729_s9, %s724_s7 }
  0x43   : > { %p728_p10 = pneg %p727_p13  ;;  %p732_p7 = por %p731_p1, %p730_p8 }
  0x45   : > { %p733_p11 = pnand %p732_p7, %p728_p10 }
  0x47   : > { %736 = shalt.err (!%p733_p11)
}
  0x48   : > { %s737_s20 = scalar_lea.vmem %s981_s22, 32  ;;  %p1096_p3 = pmov %p1095_p12 }
  0x49   : > { %p738_p0 = scmp.ne.s32.totalorder %s981_s22, %s737_s20  ;;  %s828_s6 = smov [#allocation7]  }
  0x4a   : > { %s742_s23 = sshll.u32 %s828_s6, 4  ;;  %s743_s23 = int_to_ptr.vmem [resolvable:$false] %s742_s23 }
  0x4b   : > { %p740_p12 = pnand %p738_p0, %p1096_p3  ;;  %s744_s21 = scalar_lea.vmem %s743_s23, 64 }
  0x4c   : > { %p745_p5 = scmp.lt.s32.totalorder %s981_s22, %s743_s23  ;;  %p746_p4 = scmp.lt.s32.totalorder %s744_s21, %s737_s20 }
  0x4d   : > { %p741_p13 = pneg %p740_p12 }
  0x4e   : > { %p747_p2 = por %p746_p4, %p745_p5 }
  0x50   : > { %p748_p8 = pnand %p747_p2, %p741_p13 }
  0x52   : > { %751 = shalt.err (!%p748_p8)
}
  0x53   : > { %611 = dma.hbm_to_vmem [thread:$0]  (!%p902_p6), %s979_s17, 32, %s981_s22, %s906_s30  }
  0x54   : > { %190 = sbr.rel (%p961_p9) target bundleno = 399 (0x18f), region = 32  ;;  %p1097_p10 = scmp.eq.s32.totalorder (!%p961_p9), %s935_s24, 0 }
  0x59   : > { %795 = dma.done.wait (%p1097_p10), [#allocation3], 512   ;;  %p1098_p1 = pmov %p1097_p10 }
  0x5a   : > { %s196_s25 = sand.u32 1, %s935_s24   ;;  %s1023_s5 = sand.u32 1, %s812_s13  }
  0x5b   : > { %797 = vsyncadd (%p1098_p1), [#allocation3], 4294966784  ;;  %s546_s29 = sshll.u32 %s1023_s5, 6  ;;  %s197_s7 = scalar_lea.sflag [#allocation6], %s196_s25 }
  0x5c   : > { %s200_s8 = scalar_lea.vmem [#allocation5], %s546_s29  ;;  %p1099_p6 = scmp.ne.s32.totalorder %s1090_s27, 0 }
  0x5e   : > { %799 = dma.done.wait (%p1099_p6), %s197_s7, 1056  }
  0x5f   : > { %801 = vsyncadd (%p1099_p6), %s197_s7, 4294966240  ;;  %v660_v0 = vld [vmem:[%s200_s8 + $0x38] sm:$0xff]   ;;  %v661_v1 = vld [vmem:[%s200_s8 + $0x30] sm:$0xff]   ;;  %s547_s30 = sshll.u32 %s1023_s5, 1  ;;  %v394_v46 = vlaneseq  ;;  %s548_s4 = sshll.u32 %s1023_s5, 5 }
  0x60   : > { %571 = vmatprep.subr.bf16.mxu0 %v660_v0  ;;  %v662_v2 = vld [vmem:[%s200_s8 + $0x28] sm:$0xff]   ;;  %v663_v3 = vld [vmem:[%s200_s8 + $0x20] sm:$0xff]   ;;  %v664_v7 = vld [vmem:[%s200_s8 + $0x18] sm:$0xff]   ;;  %s209_s27 = scalar_lea.vmem [#allocation7], %s547_s30  ;;  %s236_s17 = scalar_lea.vmem [#allocation8], %s548_s4 }
  0x61   : > { %572 = vmatpush3.bf16.msra.mxu0 %v660_v0  ;;  %v238_v4 = vld [vmem:[#allocation2] sm:$0xff]  ;;  %v239_v5 = vld [vmem:[#allocation2 + $0x8] sm:$0xff]  ;;  %v665_v8 = vld [vmem:[%s200_s8 + $0x10] sm:$0xff]   ;;  %v395_v47 = vshrl.u32 %v394_v46, 7  ;;  %s431_s22 = sshll.u32 %s236_s17, 4  ;;  %s558_s10 = sshll.u32 %s935_s24, 7  ;;  %s1033_s22 = int_to_ptr.vmem [resolvable:$true] %s431_s22 }
  0x62   : > { %573 = vmatprep.subr.bf16.mxu0 %v661_v1  ;;  %v242_v6 = vpack.c.bf16 %v239_v5, %v238_v4  ;;  %v666_v9 = vld [vmem:[%s200_s8 + $0x8] sm:$0xff]   ;;  %v667_v10 = vld [vmem:[%s200_s8] sm:$0xff]   ;;  %v240_v11 = vld [vmem:[#allocation2 + $0x10] sm:$0xff]  ;;  %s1038_s18 = scalar_lea.hbm %s1084_s3, %s558_s10  ;;  %s419_s24 = scalar_lea.sflag [#allocation4], %s1023_s5 }
  0x63   : > { %v241_v12 = vld [vmem:[#allocation2 + $0x18] sm:$0xff]  ;;  %v387_v48 = vld [vmem:[%s209_s27] sm:$0x3]  ;;  %v396_v50 = vsub.s32 0, %v395_v47  ;;  %v404_v55 = vsub.s32 1, %v395_v47  ;;  %s752_s20 = scalar_lea.vmem %s1033_s22, 512 }
  0x64   : > { %587 = vmatprep.mubr.bf16.mxu0 %v242_v6  ;;  %v243_v13 = vpack.c.bf16 %v241_v12, %v240_v11  ;;  %p753_p2 = scmp.ne.s32.totalorder %s1033_s22, %s752_s20  ;;  %p1100_p4 = scmp.ne.s32.totalorder %s1091_s26, 0 }
  0x65   : > { %574 = vmatpush3.bf16.msra.mxu0 %v661_v1  ;;  %s829_s6 = smov [#allocation8]  }
  0x66   : > { %575 = vmatprep.subr.bf16.mxu0 %v662_v2  ;;  %p754_p5 = pnand %p753_p2, %p1100_p4  ;;  %s756_s23 = sshll.u32 %s829_s6, 4  ;;  %s757_s23 = int_to_ptr.vmem [resolvable:$false] %s756_s23 }
  0x67   : > { %s758_s21 = scalar_lea.vmem %s757_s23, 1024  ;;  %p759_p7 = scmp.lt.s32.totalorder %s1033_s22, %s757_s23 }
  0x68   : > { %p755_p9 = pneg %p754_p5  ;;  %p760_p11 = scmp.lt.s32.totalorder %s758_s21, %s752_s20 }
  0x69   : > { %576 = vmatpush3.bf16.msra.mxu0 %v662_v2 }
  0x6a   : > { %577 = vmatprep.subr.bf16.mxu0 %v663_v3  ;;  %p761_p0 = por %p760_p11, %p759_p7 }
  0x6c   : > { %p762_p3 = pnand %p761_p0, %p755_p9 }
  0x6d   : > { %578 = vmatpush3.bf16.msra.mxu0 %v663_v3 }
  0x6e   : > { %579 = vmatprep.subr.bf16.mxu0 %v664_v7 }
  0x71   : > { %580 = vmatpush3.bf16.msra.mxu0 %v664_v7 }
  0x72   : > { %581 = vmatprep.subr.bf16.mxu0 %v665_v8 }
  0x75   : > { %582 = vmatpush3.bf16.msra.mxu0 %v665_v8 }
  0x76   : > { %583 = vmatprep.subr.bf16.mxu0 %v666_v9 }
  0x79   : > { %584 = vmatpush3.bf16.msra.mxu0 %v666_v9 }
  0x7a   : > { %585 = vmatprep.subr.bf16.mxu0 %v667_v10 }
  0x7d   : > { %586 = vmatpush3.bf16.msra.mxu0 %v667_v10 }
  0x80   : > { %588 = vmatmul.mubr.bf16.vlgmr.msra.gmra.mxu0 %v243_v13 }
 0x140   : > { %v589_v14 = vpop.f32.mrf.mxu0 }
 0x141   : > { %v370_v21 = vmul.f32 %v589_v14, %v589_v14 }
 0x142   : > { %v342_v15 = vpop.f32.mrf.mxu0 }
 0x143   : > { %v368_v18 = vmul.f32 %v342_v15, %v342_v15 }
 0x144   : > { %v590_v16 = vpop.f32.mrf.mxu0 }
 0x145   : > { %v371_v24 = vmul.f32 %v590_v16, %v590_v16 }
 0x146   : > { %v345_v17 = vpop.f32.mrf.mxu0 }
 0x147   : > { %v357_v19 = vadd.f32 %v345_v17, %v342_v15  ;;  %v369_v20 = vmul.f32 %v345_v17, %v345_v17 }
 0x149   : > { %v358_v22 = vadd.f32 %v589_v14, %v357_v19  ;;  %v372_v23 = vadd.f32 %v369_v20, %v368_v18 }
 0x14b   : > { %v359_v25 = vadd.f32 %v590_v16, %v358_v22  ;;  %v373_v26 = vadd.f32 %v372_v23, %v370_v21 }
 0x14d   : > { %v360_v27 = vrot.slane %v359_v25, 4  ;;  %v374_v28 = vadd.f32 %v373_v26, %v371_v24 }
 0x14f   : > { %v361_v29 = vadd.f32 %v360_v27, %v359_v25  ;;  %v375_v30 = vrot.slane %v374_v28, 4 }
 0x151   : > { %v362_v31 = vrot.slane %v361_v29, 2  ;;  %v376_v32 = vadd.f32 %v375_v30, %v374_v28 }
 0x153   : > { %v363_v33 = vadd.f32 %v362_v31, %v361_v29  ;;  %v377_v34 = vrot.slane %v376_v32, 2 }
 0x155   : > { %v364_v35 = vrot.slane %v363_v33, 1  ;;  %v378_v36 = vadd.f32 %v377_v34, %v376_v32 }
 0x157   : > { %v365_v37 = vadd.f32 %v364_v35, %v363_v33  ;;  %v379_v38 = vrot.slane %v378_v36, 1 }
 0x159   : > { %v367_v39 = vmul.f32 0.03125, %v365_v37  ;;  %v380_v40 = vadd.f32 %v379_v38, %v378_v36 }
 0x15b   : > { %v381_v41 = vmul.f32 0.03125, %v380_v40  ;;  %v382_v42 = vmul.f32 %v367_v39, %v367_v39 }
 0x15d   : > { %v383_v43 = vsub.f32 %v381_v41, %v382_v42 }
 0x15f   : > { %v384_v44 = vmax.f32 %v383_v43, 0.0 }
 0x161   : > { %v385_v45 = vadd.f32 1e-05, %v384_v44 }
 0x163   : > { %668 = vrsqrt.f32 %v385_v45 }
 0x170   : > { %v669_v49 = vpop.eup %668 }
 0x171   : > { %v388_v51 = vmul.f32 %v669_v49, %v387_v48 }
 0x173   : > { %v389_v52 = vmul.f32 %v388_v51, %v367_v39  ;;  %v397_v53 = vrot.slane %v388_v51, %v396_v50 }
 0x175   : > { %v391_v54 = vrot.slane %v389_v52, 7  ;;  %v398_v57 = vmul.f32 %v397_v53, %v342_v15  ;;  %v399_v58 = vmul.f32 %v397_v53, %v345_v17  ;;  %v400_v59 = vmul.f32 %v589_v14, %v397_v53 }
 0x176   : > { %v401_v60 = vmul.f32 %v590_v16, %v397_v53 }
 0x177   : > { %v393_v56 = vsub.f32 %v387_v48, %v391_v54 }
 0x179   : > { %v405_v61 = vrot.slane %v393_v56, %v404_v55 }
 0x17b   : > { %v406_v62 = vadd.f32 %v405_v61, %v398_v57  ;;  %v407_v63 = vadd.f32 %v405_v61, %v399_v58  ;;  %v408_v0 = vadd.f32 %v405_v61, %v400_v59  ;;  %v409_v1 = vadd.f32 %v405_v61, %v401_v60 }
 0x17d   : > { %v410_v2 = vmax.f32 %v406_v62, 0.0  ;;  %v411_v3 = vmax.f32 %v407_v63, 0.0  ;;  %v412_v4 = vmax.f32 %v408_v0, 0.0  ;;  %v413_v5 = vmax.f32 %v409_v1, 0.0 }
 0x17f   : > { %414 = vst [vmem:[%s236_s17] sm:$0xff] %v410_v2  ;;  %415 = vst [vmem:[%s236_s17 + $0x8] sm:$0xff] %v411_v3 }
 0x180   : > { %416 = vst [vmem:[%s236_s17 + $0x10] sm:$0xff] %v412_v4  ;;  %417 = vst [vmem:[%s236_s17 + $0x18] sm:$0xff] %v413_v5 }
 0x181   : > { %765 = shalt.err (!%p762_p3)
}
 0x182   : > { %s766_s25 = scalar_lea.hbm %s1038_s18, 512  ;;  %s770_s8 = scalar_lea.hbm %s1084_s3, 1024 }
 0x183   : > { %p767_p12 = scmp.ne.s32.totalorder %s1038_s18, %s766_s25  ;;  %p771_p10 = scmp.lt.s32.totalorder %s1038_s18, %s1084_s3 }
 0x184   : > { %p772_p1 = scmp.lt.s32.totalorder %s770_s8, %s766_s25 }
 0x185   : > { %p768_p13 = pnand %p767_p12, %p1100_p4 }
 0x186   : > { %p773_p6 = por %p772_p1, %p771_p10 }
 0x187   : > { %p769_p8 = pneg %p768_p13 }
 0x189   : > { %p774_p2 = pnand %p773_p6, %p769_p8 }
 0x18b   : > { %777 = shalt.err (!%p774_p2)
}
 0x18c   : > { %s830_s4 = smov 128   ;;  %s831_s17 = smov 256  }
 0x18d   : > { %s832_s10 = smov 8  }
 0x18e   : > { %599 = dma.vmem_to_hbm [thread:$0]  (%p1100_p4), %s1033_s22, 512, %s1038_s18, %s419_s24, %s830_s4, %s831_s17, %s832_s10  }
 0x18f PF: > { %s446_s9 = sand.u32 1, %s808_s12   ;;  %p1101_p5 = scmp.ne.s32.totalorder %s1092_s28, 0 }
 0x190   : > { %p1102_p9 = scmp.ge.s32.totalorder %s820_s15, 2  ;;  %s447_s11 = scalar_lea.sflag [#allocation4], %s446_s9 }
 0x192   : > { %p613_p7 = pnand %p1102_p9, %p1101_p5 }
 0x194   : > { %p614_p11 = pneg %p613_p7 }
 0x196   : > { %803 = dma.done.wait (%p614_p11), %s447_s11, 512  }
 0x197   : > { %805 = vsyncadd (%p614_p11), %s447_s11, 4294966784  ;;  %p17_p0 = scmp.ge.s32.totalorder %s874_s16, 4   ;;  %s1103_s12 = smov %s812_s13 }
 0x198   : > { %s1104_s13 = smov %s816_s14  ;;  %s1105_s14 = smov %s884_s19 }
 0x199   : > { %s1106_s15 = smov %s874_s16  ;;  %19 = sbr.rel (!%p17_p0) target bundleno = 6 (0x6), region = 93 }
 0x19e   :  { %452 = vsyncpa [#allocation3], 1 }
 0x19f   :  { %454 = vsyncpa [#allocation3 + $0x1], 1 }
 0x1a0   :  { %455 = vsyncpa [#allocation6], 1 }
 0x1a1   :  { %457 = vsyncpa [#allocation6 + $0x1], 1 }
 0x1a2   :  { %458 = vsyncpa [#allocation4], 1 }
 0x1a3   :  { %460 = vsyncpa [#allocation4 + $0x1], 1 }

</bundles_post_ra>
